<compile_context>
chip_gen: v7x
topology: tpu7x:2x2x1
jax: 0.10.0
libtpu: 0.0.40
codegen_flags: <defaults>
</compile_context>

<pallas_src>
import functools

import jax
import jax.numpy as jnp
from jax.experimental import pallas as pl
from jax.experimental.pallas import tpu as pltpu

BN_EPS = 1e-5


def _round_up(x, m):
    return (x + m - 1) // m * m


def _vmem_capacity_bytes():
    try:
        return int(pltpu.get_tpu_info().vmem_capacity_bytes)
    except Exception:
        return 64 * (1 << 20)  # conservative (v7x-sized) fallback


def _choose_tiles(n, c_pad, max_tile_rows, max_tile_k):
    """Pick (tm, tk) for the streamed adjacency matmul from this generation's VMEM size."""
    vmem_cap = _vmem_capacity_bytes()
    budget = max(vmem_cap - (8 << 20), 16 << 20)   # headroom below physical VMEM

    tk = max(128, (min(int(max_tile_k), _round_up(n, 128)) // 128) * 128)

    # tm-independent bytes: double-buffered XW K-tile + bias + per-tile stats blocks
    const = 2 * tk * c_pad * 2 + 4 * 8 * c_pad * 4
    # per-row bytes: A tile (bf16 x2), h tile (bf16 x2), f32 accumulator, dinv (lane-padded x2)
    per_row = 2 * tk * 2 + 2 * c_pad * 2 + c_pad * 4 + 2 * 128 * 4
    tm = (budget - const) // per_row
    tm = min(int(tm), int(max_tile_rows))
    n_rows = _round_up(n, 16)
    if tm >= n_rows:
        tm = n_rows                      # one tile covers all rows, minimal padding
    elif tm >= 256:
        tm = (tm // 256) * 256           # MXU-friendly on v6e / v7x
    else:
        tm = max(16, (tm // 16) * 16)    # bf16 sublane packing / v5e
    return int(tm), int(tk), vmem_cap


def _pass1_kernel(a_ref, xw_ref, dinv_ref, bias_ref, h_ref, stats_ref, acc_ref):
    """Grid = (row tiles, K tiles). Accumulate A01_tile @ XW_tile over K; finalize on last K."""
    k = pl.program_id(1)

    @pl.when(k == 0)
    def _init():
        acc_ref[...] = jnp.zeros_like(acc_ref)

    acc_ref[...] += jnp.dot(a_ref[...], xw_ref[...], preferred_element_type=jnp.float32)

    @pl.when(k == pl.num_programs(1) - 1)
    def _finalize():
        # h = relu(D^-1/2 * (A01 @ (D^-1/2 XW)) + bias); padded A rows are all-zero so they
        # produce the constant relu(bias), which the wrapper subtracts from the statistics.
        h = jnp.maximum(acc_ref[...] * dinv_ref[...] + bias_ref[...], 0.0)
        h_ref[...] = h.astype(h_ref.dtype)
        stats_ref[...] = jnp.zeros_like(stats_ref)
        stats_ref[0:1, :] = jnp.sum(h, axis=0, keepdims=True)
        stats_ref[1:2, :] = jnp.sum(h * h, axis=0, keepdims=True)


def _pass2_kernel(h_ref, scale_ref, shift_ref, o_ref, *, c_half_slab, out_width):
    """BatchNorm affine + MaxPool1d(2). Even channels live in lanes [0, C/2), odd channels in
    lanes [c_half_slab, c_half_slab + C/2); a half-width roll swaps the two slabs so pooling is
    a single lane-aligned VPU max with a lane-dense (128-multiple) output."""
    hn = h_ref[...].astype(jnp.float32) * scale_ref[...] + shift_ref[...]
    swapped = pltpu.roll(hn, c_half_slab, 1)   # roll by exactly half the width == slab swap
    pooled = jnp.maximum(hn, swapped)
    o_ref[...] = pooled[:, :out_width]


def gcn_block_segpr(x, edge_index, weight, bias, gamma, beta, *,
                    max_tile_rows=2048, max_tile_k=1024):
    n, c_in = x.shape
    c_out = weight.shape[0]
    assert c_out % 2 == 0, "MaxPool1d(2) requires an even number of output channels"
    c_half = c_out // 2

    # --- padded geometry: features padded to 128, pooled output kept lane-dense ---
    c_pad = _round_up(c_out, 128)
    c_half_slab = c_pad // 2                   # odd channels start at this lane offset
    c_out_half_pad = _round_up(c_half, 128)    # pooled output width (128-multiple)

    tm, tk, vmem_cap = _choose_tiles(n, c_pad, max_tile_rows, max_tile_k)
    mr = _round_up(n, tm)
    kc = _round_up(n, tk)
    num_i = mr // tm
    num_k = kc // tk

    # --- graph operands: 0/1 self-looped adjacency (exact in bf16) + D^-1/2 ---
    # TODO(synk): for very large / sparse graphs replace this dense O(N^2) adjacency with a
    # gather / segment-sum aggregation kernel; here aggregation is a dense streamed matmul.
    loop = jnp.arange(n, dtype=edge_index.dtype)
    src = jnp.concatenate([edge_index[0], loop])
    dst = jnp.concatenate([edge_index[1], loop])
    a01 = jnp.zeros((mr, kc), jnp.float32).at[dst, src].add(1.0)
    deg = jnp.sum(a01, axis=1)                              # in-degree incl. self loop
    dinv = jnp.where(deg > 0, jax.lax.rsqrt(deg), 0.0)      # (mr,); padded rows -> 0
    a01 = a01.astype(jnp.bfloat16)                          # small integer counts: exact
    dinv_p = dinv.reshape(mr, 1).astype(jnp.float32)

    # --- channel permutation for the slab max-pool: even -> [0,c_half), odd -> [slab,...) ---
    ch_idx = jnp.concatenate([jnp.arange(0, c_out, 2), jnp.arange(1, c_out, 2)])
    col_idx = jnp.concatenate([jnp.arange(c_half), c_half_slab + jnp.arange(c_half)])
    wt_p = jnp.zeros((c_in, c_pad), jnp.float32).at[:, col_idx].set(
        weight.T.astype(jnp.float32)[:, ch_idx])
    bias_p = jnp.zeros((c_pad,), jnp.float32).at[col_idx].set(bias.astype(jnp.float32)[ch_idx])
    gamma_p = jnp.zeros((c_pad,), jnp.float32).at[col_idx].set(gamma.astype(jnp.float32)[ch_idx])
    beta_p = jnp.zeros((c_pad,), jnp.float32).at[col_idx].set(beta.astype(jnp.float32)[ch_idx])

    # --- projection hoisted out of the kernel; D^-1/2 folded into XW rows (bf16 operand) ---
    xw = (x.astype(jnp.float32) @ wt_p) * dinv[:n, None]
    xw_p = jnp.zeros((kc, c_pad), jnp.bfloat16).at[:n, :].set(xw.astype(jnp.bfloat16))
    bias_row = bias_p.reshape(1, c_pad)

    # --- pass 1: streamed aggregation + ReLU + per-row-tile BN partial statistics ---
    req1 = (2 * tm * tk * 2 + 2 * tk * c_pad * 2 + 2 * tm * 128 * 4 + 2 * 8 * c_pad * 4
            + 2 * tm * c_pad * 2 + 2 * 8 * c_pad * 4 + tm * c_pad * 4)
    vmem1 = int(min(max(req1 * 1.25 + (2 << 20), 16 << 20), vmem_cap))

    h_bf16, stats = pl.pallas_call(
        _pass1_kernel,
        out_shape=(jax.ShapeDtypeStruct((mr, c_pad), jnp.bfloat16),
                   jax.ShapeDtypeStruct((num_i * 8, c_pad), jnp.float32)),
        grid_spec=pltpu.PrefetchScalarGridSpec(
            num_scalar_prefetch=0,
            grid=(num_i, num_k),
            in_specs=[
                pl.BlockSpec((tm, tk), lambda i, k: (i, k)),      # A01 tile (streamed)
                pl.BlockSpec((tk, c_pad), lambda i, k: (k, 0)),   # prescaled XW K-tile
                pl.BlockSpec((tm, 1), lambda i, k: (i, 0)),       # per-row D^-1/2
                pl.BlockSpec((1, c_pad), lambda i, k: (0, 0)),    # bias (tiny resident)
            ],
            out_specs=[
                pl.BlockSpec((tm, c_pad), lambda i, k: (i, 0)),   # h (bf16) row tile
                pl.BlockSpec((8, c_pad), lambda i, k: (i, 0)),    # per-tile BN partials
            ],
            scratch_shapes=[pltpu.VMEM((tm, c_pad), jnp.float32)],
        ),
        compiler_params=pltpu.CompilerParams(
            dimension_semantics=("parallel", "arbitrary"),
            vmem_limit_bytes=vmem1,
        ),
    )(a01, xw_p, dinv_p, bias_row)

    # --- combine partial statistics (padded rows contribute the constant relu(bias)) ---
    stats = stats.reshape(num_i, 8, c_pad)
    pad_rows = float(mr - n)
    bias_relu = jnp.maximum(bias_p, 0.0)
    sums = jnp.sum(stats[:, 0, :], axis=0) - pad_rows * bias_relu
    sqs = jnp.sum(stats[:, 1, :], axis=0) - pad_rows * bias_relu * bias_relu
    mean = sums / float(n)
    # TODO(synk): E[h^2]-mean^2 in f32 can lose precision for very large N; a shifted or
    # two-pass variance would be more robust in that regime.
    var = jnp.maximum(sqs / float(n) - mean * mean, 0.0)
    scale_vec = gamma_p * jax.lax.rsqrt(var + BN_EPS)
    shift_vec = beta_p - mean * scale_vec
    scale = scale_vec.reshape(1, c_pad)
    shift = shift_vec.reshape(1, c_pad)

    # --- pass 2: BatchNorm affine + MaxPool1d(2) as a half-slab max (pipelined row tiles) ---
    req2 = 2 * tm * c_pad * 2 + 4 * 8 * c_pad * 4 + 2 * tm * c_out_half_pad * 4
    vmem2 = int(min(max(req2 * 1.25 + (2 << 20), 16 << 20), vmem_cap))
    pooled = pl.pallas_call(
        functools.partial(_pass2_kernel, c_half_slab=c_half_slab, out_width=c_out_half_pad),
        out_shape=jax.ShapeDtypeStruct((mr, c_out_half_pad), jnp.float32),
        grid_spec=pltpu.PrefetchScalarGridSpec(
            num_scalar_prefetch=0,
            grid=(num_i,),
            in_specs=[
                pl.BlockSpec((tm, c_pad), lambda i: (i, 0)),
                pl.BlockSpec((1, c_pad), lambda i: (0, 0)),
                pl.BlockSpec((1, c_pad), lambda i: (0, 0)),
            ],
            out_specs=pl.BlockSpec((tm, c_out_half_pad), lambda i: (i, 0)),
        ),
        compiler_params=pltpu.CompilerParams(
            dimension_semantics=("parallel",),
            vmem_limit_bytes=vmem2,
        ),
    )(h_bf16, scale, shift)

    return pooled[:n, :c_half]


def reference(x, edge_index, weight, bias, gamma, beta):
    """Pure f32 JAX reference: GCNConv (gcn_norm, self loops) -> ReLU -> BatchNorm1d (batch
    statistics) -> MaxPool1d(2)."""
    n = x.shape[0]
    loop = jnp.arange(n, dtype=edge_index.dtype)
    src = jnp.concatenate([edge_index[0], loop])
    dst = jnp.concatenate([edge_index[1], loop])
    a = jnp.zeros((n, n), jnp.float32).at[dst, src].add(1.0)
    deg = jnp.sum(a, axis=1)
    dinv = jnp.where(deg > 0, jax.lax.rsqrt(deg), 0.0)
    a_hat = dinv[:, None] * a * dinv[None, :]
    h = a_hat @ (x @ weight.T) + bias[None, :]
    h = jnp.maximum(h, 0.0)
    mean = jnp.mean(h, axis=0, keepdims=True)
    var = jnp.mean((h - mean) ** 2, axis=0, keepdims=True)
    hn = (h - mean) * jax.lax.rsqrt(var + BN_EPS) * gamma[None, :] + beta[None, :]
    c = hn.shape[1]
    return jnp.max(hn.reshape(n, c // 2, 2), axis=-1)


if __name__ == "__main__":
    key = jax.random.PRNGKey(0)
    k_x, k_w, k_b, k_g, k_be, k_src, k_off = jax.random.split(key, 7)

    num_nodes, c_in, c_out, num_edges = 300, 16, 12, 900

    x = jax.random.normal(k_x, (num_nodes, c_in), dtype=jnp.float32)
    # random directed edges with no self loops
    src = jax.random.randint(k_src, (num_edges,), 0, num_nodes, dtype=jnp.int32)
    off = jax.random.randint(k_off, (num_edges,), 1, num_nodes, dtype=jnp.int32)
    dst = (src + off) % num_nodes
    edge_index = jnp.stack([src, dst], axis=0)          # [2, E]

    weight = jax.random.normal(k_w, (c_out, c_in), dtype=jnp.float32) * 0.3
    bias = jax.random.normal(k_b, (c_out,), dtype=jnp.float32) * 0.1
    gamma = 1.0 + 0.2 * jax.random.normal(k_g, (c_out,), dtype=jnp.float32)
    beta = 0.1 * jax.random.normal(k_be, (c_out,), dtype=jnp.float32)

    # small tiles so the multi-row-tile / multi-K-tile / padded-row correction paths run
    out = gcn_block_segpr(x, edge_index, weight, bias, gamma, beta,
                          max_tile_rows=64, max_tile_k=128)
    out = jax.block_until_ready(out)

    ref = reference(x, edge_index, weight, bias, gamma, beta)
    assert out.shape == (num_nodes, c_out // 2), out.shape
    err = float(jnp.max(jnp.abs(out - ref)))
    assert jnp.allclose(out, ref, rtol=3e-2, atol=3e-2), err

    print("KERNEL_OK")
</pallas_src>

<mosaic_0001>
module attributes {stable_mosaic.version = 11 : i64} {
  func.func @_pass1_kernel(%arg0: i32, %arg1: i32, %arg2: memref<64x128xbf16, #tpu.memory_space<vmem>>, %arg3: memref<128x128xbf16, #tpu.memory_space<vmem>>, %arg4: memref<64x1xf32, #tpu.memory_space<vmem>>, %arg5: memref<1x128xf32, #tpu.memory_space<vmem>>, %arg6: memref<64x128xbf16, #tpu.memory_space<vmem>>, %arg7: memref<8x128xf32, #tpu.memory_space<vmem>>, %arg8: memref<64x128xf32, #tpu.memory_space<vmem>>) attributes {dimension_semantics = [#tpu.dimension_semantics<parallel>, #tpu.dimension_semantics<arbitrary>], iteration_bounds = array<i64: 5, 3>, scalar_prefetch = 0 : i64, scratch_operands = 1 : i64, tpu.core_type = #tpu.core_type<tc>, window_params = [{transform_indices = @transform_0, window_bounds = array<i64: 64, 128>}, {transform_indices = @transform_1, window_bounds = array<i64: 128, 128>}, {transform_indices = @transform_2, window_bounds = array<i64: 64, 1>}, {pipeline_mode = #tpu.pipeline_mode<synchronous>, transform_indices = @transform_3, window_bounds = array<i64: 1, 128>}, {transform_indices = @transform_4, window_bounds = array<i64: 64, 128>}, {transform_indices = @transform_5, window_bounds = array<i64: 8, 128>}]} {
    %c0_i32 = arith.constant 0 : i32
    %0 = arith.cmpi eq, %arg1, %c0_i32 : i32
    %1 = arith.extui %0 : i1 to i32
    %c0_i32_0 = arith.constant 0 : i32
    %2 = arith.cmpi ne, %1, %c0_i32_0 : i32
    scf.if %2 {
      %cst_9 = arith.constant 0.000000e+00 : f32
      %12 = vector.broadcast %cst_9 : f32 to vector<64x128xf32>
      %c0_10 = arith.constant 0 : index
      %c0_11 = arith.constant 0 : index
      %13 = vector.load %arg8[%c0_10, %c0_11] : memref<64x128xf32, #tpu.memory_space<vmem>>, vector<64x128xf32>
      tpu.vector_store %arg8[%c0_10, %c0_11], %12 {strides = array<i32>} : memref<64x128xf32, #tpu.memory_space<vmem>>, vector<64x128xf32>,
    } else {
    }
    %c0 = arith.constant 0 : index
    %c0_1 = arith.constant 0 : index
    %3 = vector.load %arg8[%c0, %c0_1] : memref<64x128xf32, #tpu.memory_space<vmem>>, vector<64x128xf32>
    %c0_2 = arith.constant 0 : index
    %c0_3 = arith.constant 0 : index
    %4 = vector.load %arg2[%c0_2, %c0_3] : memref<64x128xbf16, #tpu.memory_space<vmem>>, vector<64x128xbf16>
    %c0_4 = arith.constant 0 : index
    %c0_5 = arith.constant 0 : index
    %5 = vector.load %arg3[%c0_4, %c0_5] : memref<128x128xbf16, #tpu.memory_space<vmem>>, vector<128x128xbf16>
    %cst = arith.constant dense<0.000000e+00> : vector<64x128xf32>
    %6 = tpu.matmul %4, %5, %cst {dimension_numbers = #tpu.dot_dimension_numbers<[1], [0], [0], [1], [0, 0, 1, 1], [], []>} : vector<64x128xbf16>, vector<128x128xbf16>, vector<64x128xf32> -> vector<64x128xf32>
    %7 = arith.addf %3, %6 : vector<64x128xf32>
    %c0_6 = arith.constant 0 : index
    %c0_7 = arith.constant 0 : index
    %8 = vector.load %arg8[%c0_6, %c0_7] : memref<64x128xf32, #tpu.memory_space<vmem>>, vector<64x128xf32>
    tpu.vector_store %arg8[%c0_6, %c0_7], %7 {strides = array<i32>} : memref<64x128xf32, #tpu.memory_space<vmem>>, vector<64x128xf32>,
    %c2_i32 = arith.constant 2 : i32
    %9 = arith.cmpi eq, %arg1, %c2_i32 : i32
    %10 = arith.extui %9 : i1 to i32
    %c0_i32_8 = arith.constant 0 : i32
    %11 = arith.cmpi ne, %10, %c0_i32_8 : i32
    scf.if %11 {
      %c0_9 = arith.constant 0 : index
      %c0_10 = arith.constant 0 : index
      %12 = vector.load %arg8[%c0_9, %c0_10] : memref<64x128xf32, #tpu.memory_space<vmem>>, vector<64x128xf32>
      %c0_11 = arith.constant 0 : index
      %c0_12 = arith.constant 0 : index
      %13 = vector.load %arg4[%c0_11, %c0_12] : memref<64x1xf32, #tpu.memory_space<vmem>>, vector<64x1xf32>
      %14 = vector.broadcast %13 : vector<64x1xf32> to vector<64x128xf32>
      %15 = arith.mulf %12, %14 : vector<64x128xf32>
      %c0_13 = arith.constant 0 : index
      %c0_14 = arith.constant 0 : index
      %16 = vector.load %arg5[%c0_13, %c0_14] : memref<1x128xf32, #tpu.memory_space<vmem>>, vector<1x128xf32>
      %17 = vector.broadcast %16 : vector<1x128xf32> to vector<64x128xf32>
      %18 = arith.addf %15, %17 : vector<64x128xf32>
      %cst_15 = arith.constant 0.000000e+00 : f32
      %19 = vector.broadcast %cst_15 : f32 to vector<64x128xf32>
      %20 = arith.maximumf %18, %19 : vector<64x128xf32>
      %21 = arith.truncf %20 : vector<64x128xf32> to vector<64x128xbf16>
      %c0_16 = arith.constant 0 : index
      %c0_17 = arith.constant 0 : index
      %22 = vector.load %arg6[%c0_16, %c0_17] : memref<64x128xbf16, #tpu.memory_space<vmem>>, vector<64x128xbf16>
      tpu.vector_store %arg6[%c0_16, %c0_17], %21 {strides = array<i32>} : memref<64x128xbf16, #tpu.memory_space<vmem>>, vector<64x128xbf16>,
      %cst_18 = arith.constant 0.000000e+00 : f32
      %23 = vector.broadcast %cst_18 : f32 to vector<8x128xf32>
      %c0_19 = arith.constant 0 : index
      %c0_20 = arith.constant 0 : index
      %24 = vector.load %arg7[%c0_19, %c0_20] : memref<8x128xf32, #tpu.memory_space<vmem>>, vector<8x128xf32>
      tpu.vector_store %arg7[%c0_19, %c0_20], %23 {strides = array<i32>} : memref<8x128xf32, #tpu.memory_space<vmem>>, vector<8x128xf32>,
      %cst_21 = arith.constant dense<0.000000e+00> : vector<128xf32>
      %25 = vector.multi_reduction <add>, %20, %cst_21 [0] : vector<64x128xf32> to vector<128xf32>
      %26 = vector.shape_cast %25 : vector<128xf32> to vector<1x128xf32>
      %c0_22 = arith.constant 0 : index
      %c0_23 = arith.constant 0 : index
      %27 = vector.load %arg7[%c0_22, %c0_23] : memref<8x128xf32, #tpu.memory_space<vmem>>, vector<1x128xf32>
      tpu.vector_store %arg7[%c0_22, %c0_23], %26 {strides = array<i32>} : memref<8x128xf32, #tpu.memory_space<vmem>>, vector<1x128xf32>,
      %28 = arith.mulf %20, %20 : vector<64x128xf32>
      %cst_24 = arith.constant dense<0.000000e+00> : vector<128xf32>
      %29 = vector.multi_reduction <add>, %28, %cst_24 [0] : vector<64x128xf32> to vector<128xf32>
      %30 = vector.shape_cast %29 : vector<128xf32> to vector<1x128xf32>
      %c1 = arith.constant 1 : index
      %c0_25 = arith.constant 0 : index
      %31 = vector.load %arg7[%c1, %c0_25] : memref<8x128xf32, #tpu.memory_space<vmem>>, vector<1x128xf32>
      tpu.vector_store %arg7[%c1, %c0_25], %30 {strides = array<i32>} : memref<8x128xf32, #tpu.memory_space<vmem>>, vector<1x128xf32>,
    } else {
    }
    return
  }
  func.func @transform_0(%arg0: i32, %arg1: i32) -> (i32, i32) {
    %c0_i32 = arith.constant 0 : i32
    return %arg0, %arg1 : i32, i32
  }
  func.func @transform_1(%arg0: i32, %arg1: i32) -> (i32, i32) {
    %c0_i32 = arith.constant 0 : i32
    %c0_i32_0 = arith.constant 0 : i32
    return %arg1, %c0_i32 : i32, i32
  }
  func.func @transform_2(%arg0: i32, %arg1: i32) -> (i32, i32) {
    %c0_i32 = arith.constant 0 : i32
    %c0_i32_0 = arith.constant 0 : i32
    return %arg0, %c0_i32 : i32, i32
  }
  func.func @transform_3(%arg0: i32, %arg1: i32) -> (i32, i32) {
    %c0_i32 = arith.constant 0 : i32
    %c0_i32_0 = arith.constant 0 : i32
    %c0_i32_1 = arith.constant 0 : i32
    return %c0_i32, %c0_i32_0 : i32, i32
  }
  func.func @transform_4(%arg0: i32, %arg1: i32) -> (i32, i32) {
    %c0_i32 = arith.constant 0 : i32
    %c0_i32_0 = arith.constant 0 : i32
    return %arg0, %c0_i32 : i32, i32
  }
  func.func @transform_5(%arg0: i32, %arg1: i32) -> (i32, i32) {
    %c0_i32 = arith.constant 0 : i32
    %c0_i32_0 = arith.constant 0 : i32
    return %arg0, %c0_i32 : i32, i32
  }
}

</mosaic_0001>

<bundles_post_ra>
// kernel: tpu_custom_call.1
= control target key start
LH: loop header
LB: loop body
LE: loop exit
PB: predicated region body
PF: predicated region fallthrough
CT: control target
= control target key end

     0   :  { %s1643_s0 = inlined_call_operand.hbm [shape: bf16[320,384], index: 0, kind: input, shape index: {}]   ;;  %s1644_s1 = inlined_call_operand.vmem [shape: bf16[384,128], index: 1, kind: input, shape index: {}]   ;;  %s1645_s2 = inlined_call_operand.vmem [shape: f32[320,1], index: 2, kind: input, shape index: {}]   ;;  %s1646_s3 = inlined_call_operand.vmem [shape: f32[1,128], index: 3, kind: input, shape index: {}]   ;;  %s1647_s4 = inlined_call_operand.hbm [shape: bf16[320,128], index: 4, kind: output, shape index: {0}]   ;;  %s1648_s5 = inlined_call_operand.hbm [shape: f32[40,128], index: 5, kind: output, shape index: {1}]  }
   0x1   :  { %1654 = sst [smem:[#allocation18_spill]] %s1643_s0 }
   0x2   :  { %11 = vsyncpa [#allocation4], 0 }
   0x3   :  { %13 = vsyncpa [#allocation4 + $0x1], 0 }
   0x4   :  { %14 = vsyncpa [#allocation5], 0 }
   0x5   :  { %16 = vsyncpa [#allocation5 + $0x1], 0 }
   0x6   :  { %17 = vsyncpa [#allocation8], 0 }
   0x7   :  { %19 = vsyncpa [#allocation8 + $0x1], 0  ;;  %s1343_s18 = smov 0   ;;  %s1345_s19 = smov 0  }
   0x8   :  { %s1347_s20 = smov 0   ;;  %s1349_s21 = smov 0  }
   0x9   :  { %s1351_s22 = smov 0   ;;  %s1353_s23 = smov 0  }
   0xa   :  { %s1355_s24 = smov 0   ;;  %s1357_s25 = smov 0  }
   0xb   :  { %s1359_s26 = smov 0   ;;  %s1361_s27 = smov 0  }
   0xc   :  { %s1363_s28 = smov 0  }
   0xd LB: > { %1655 = sst [smem:[#allocation12_spill]] %s1292_s26  ;;  %s856_s29 = sadd.s32 4294967295, %s1300_s28   ;;  %s1300_s28 = sphi %s1363_s28, %s25_s28   ;;  %s1296_s27 = sphi %s1361_s27, %s1674_s27   ;;  %s1292_s26 = sphi %s1359_s26, %s1673_s26   ;;  %s1288_s25 = sphi %s1357_s25, %s1672_s25   ;;  %s1284_s24 = sphi %s1355_s24, %s1671_s24   ;;  %s1280_s23 = sphi %s1353_s23, %s1680_s23   ;;  %s1276_s22 = sphi %s1351_s22, %s1679_s22   ;;  %s1272_s21 = sphi %s1349_s21, %s1678_s21   ;;  %s1268_s20 = sphi %s1347_s20, %s1677_s20   ;;  %s1264_s19 = sphi %s1345_s19, %s1676_s19   ;;  %s1260_s18 = sphi %s1343_s18, %s1675_s18  }
   0xe   : > { %1656 = sst [smem:[#allocation13_spill]] %s1296_s27  ;;  %s857_s30 = sadd.s32 4294967294, %s1300_s28  }
   0xf   : > { %s34_s6 = sadd.s32 1, %s1292_s26  ;;  %s37_s7 = sadd.s32 1, %s1296_s27 }
  0x10   : > { %p35_p0 = scmp.ge.s32.totalorder %s34_s6, 3  ;;  %s46_s8 = sadd.s32 1, %s1280_s23 }
  0x11   : > { %p53_p1 = scmp.ne.s32.totalorder %s1280_s23, %s1276_s22  ;;  %p54_p2 = scmp.eq.s32.totalorder %s1300_s28, 0 }
  0x12   : > { %s1682_s6 = smov (%p35_p0, %s34_s6), 0  ;;  %s1684_s7 = smov (!%p35_p0, %s37_s7), %s1296_s27 }
  0x13   : > { %1657 = sst [smem:[#allocation14_spill]] %s1682_s6  ;;  %s42_s9 = ssub.s32 %s1292_s26, %s1682_s6 }
  0x14   : > { %p1409_p3 = por %p54_p2, %p53_p1  ;;  %p39_p4 = scmp.ge.s32.totalorder %s1684_s7, 5 }
  0x15   : > { %p59_p5 = scmp.ne.s32.totalorder %s1276_s22, %s1272_s21  ;;  %p60_p6 = scmp.eq.s32.totalorder %s856_s29, 0 }
  0x16   : > { %s145_s11 = sadd.s32 1, %s1268_s20  ;;  %s1686_s7 = smov (%p39_p4, %s1684_s7), 0 }
  0x17   : > { %1659 = sst [smem:[#allocation15_spill]] %s1686_s7  ;;  %p1417_p7 = por %p60_p6, %p59_p5 }
  0x18   : > { %p155_p8 = scmp.ne.s32.totalorder %s1268_s20, %s1264_s19  ;;  %s41_s13 = ssub.s32 %s1296_s27, %s1686_s7 }
  0x19   : > { %p156_p9 = scmp.eq.s32.totalorder %s856_s29, 14  ;;  %s43_s14 = sor.u32 %s42_s9, %s41_s13 }
  0x1a   : > { %p143_p10 = scmp.eq.s32.totalorder %s41_s13, 0  ;;  %p44_p11 = scmp.eq.s32.totalorder %s43_s14, 0 }
  0x1b   : > { %p1425_p12 = por %p156_p9, %p155_p8  ;;  %p161_p13 = scmp.ne.s32.totalorder %s1264_s19, %s1260_s18 }
  0x1c   : > { %s1430_s16 = scalar_select %p143_p10, %s1268_s20, %s145_s11  }
  0x1d   : > { %s1661_s15 = scalar_select %p1425_p12, 1, 0 }
  0x1e   : > { %1662 = sst [smem:[#allocation16_spill]] %s1430_s16  ;;  %p162_p0 = scmp.eq.s32.totalorder %s857_s30, 14 }
  0x1f   : > { %s1433_s17 = scalar_select %p44_p11, %s1280_s23, %s46_s8  }
  0x20   : > { %p1004_p1 = scmp.lt.s32.totalorder %s1300_s28, 15  ;;  %p1438_p2 = por %p162_p0, %p161_p13 }
  0x21   : > { %1663 = sst [smem:[#allocation17_spill]] %s1433_s17  ;;  %s211_s29 = sand.u32 1, %s1280_s23  }
  0x22   : > { %s1664_s21 = scalar_select %p1438_p2, 1, 0 }
  0x23   : > { %s860_s9 = sshll.u32 %s211_s29, 5  ;;  %s986_s7 = smul.u32 24, %s1296_s27 }
  0x24   : > { %s215_s13 = scalar_lea.vmem [#allocation3], %s860_s9  ;;  %p1446_p4 = pnand %p1004_p1, %p1409_p3 }
  0x25   : > { %s224_s14 = sshll.u32 %s215_s13, 4  ;;  %s221_s8 = sadd.s32 %s1292_s26, %s986_s7  ;;  %s1451_s14 = int_to_ptr.vmem [resolvable:$true] %s224_s14 }
  0x26   : > { %s863_s30 = sshll.u32 %s221_s8, 6  ;;  %s1666_s0 = sld [smem:[#allocation18_spill]] }
  0x27   : > { %s1458_s10 = scalar_lea.sflag [#allocation4], %s211_s29  ;;  %p1118_p5 = pneg %p1446_p4 }
  0x2c   : > { %s1456_s16 = scalar_lea.hbm %s1666_s0, %s863_s30  ;;  %s1121_s17 = scalar_lea.hbm %s1666_s0, 7680 }
  0x2d   : > { %s1116_s9 = scalar_lea.hbm %s1456_s16, 512  ;;  %p1122_p9 = scmp.lt.u32.totalorder %s1456_s16, %s1666_s0 }
  0x2e   : > { %p1117_p3 = scmp.ne.s32.totalorder %s1456_s16, %s1116_s9  ;;  %p1123_p10 = scmp.lt.u32.totalorder %s1121_s17, %s1116_s9 }
  0x2f   : > { %p1125_p13 = scmp.lt.u32.totalorder %s1116_s9, %s1456_s16 }
  0x30   : > { %p1119_p6 = pnand %p1118_p5, %p1117_p3  ;;  %p1124_p11 = por %p1123_p10, %p1122_p9 }
  0x32   : > { %p1120_p8 = pneg %p1119_p6  ;;  %p1126_p0 = por %p1125_p13, %p1124_p11 }
  0x34   : > { %p1127_p1 = pnand %p1126_p0, %p1120_p8 }
  0x36   : > { %1130 = shalt.err (!%p1127_p1)
}
  0x37   : > { %s1131_s29 = scalar_lea.vmem %s1451_s14, 512  ;;  %s1302_s11 = smov [#allocation3]  }
  0x38   : > { %p1132_p3 = scmp.ne.s32.totalorder %s1451_s14, %s1131_s29  ;;  %s1136_s7 = sshll.u32 %s1302_s11, 4  ;;  %s1137_s7 = int_to_ptr.vmem [resolvable:$false] %s1136_s7 }
  0x39   : > { %s1138_s13 = scalar_lea.vmem %s1137_s7, 1024  ;;  %p1139_p12 = scmp.lt.s32.totalorder %s1451_s14, %s1137_s7 }
  0x3a   : > { %p1134_p6 = pnand %p1132_p3, %p1118_p5  ;;  %p1140_p9 = scmp.lt.s32.totalorder %s1138_s13, %s1131_s29 }
  0x3c   : > { %p1135_p2 = pneg %p1134_p6  ;;  %p1141_p10 = por %p1140_p9, %p1139_p12 }
  0x3e   : > { %p1142_p11 = pnand %p1141_p10, %p1135_p2 }
  0x40   : > { %1145 = shalt.err (!%p1142_p11)
}
  0x41   : > { %s1303_s9 = smov 192   ;;  %s1304_s17 = smov 64  }
  0x42   : > { %s1305_s8 = smov 4   ;;  %p864_p5 = scmp.ge.s32.totalorder %s1300_s28, 1 }
  0x43   : > { %996 = dma.hbm_to_vmem [thread:$0]  (!%p1446_p4), %s1456_s16, 512, %s1451_s14, %s1458_s10, %s1303_s9, %s1304_s17, %s1305_s8  }
  0x44   : > { %p250_p8 = scmp.lt.s32.totalorder %s1300_s28, 16 }
  0x46   : > { %p251_p13 = pnand %p864_p5, %p250_p8 }
  0x47   : > { %s256_s30 = sand.u32 (!%p251_p13), 1, %s1276_s22  }
  0x48   : > { %254 = sbr.rel (%p251_p13) target bundleno = 439 (0x1b7), region = 36  ;;  %s865_s29 = sshll.u32 (!%p251_p13), %s256_s30, 5 }
  0x49   : > { %s257_s11 = scalar_lea.sflag (!%p251_p13), [#allocation4], %s256_s30  ;;  %s1489_s7 = scalar_lea.vmem (!%p251_p13), [#allocation3], %s865_s29 }
  0x4f   : > { %1247 = dma.done.wait (%p1417_p7), %s257_s11, 512  }
  0x50   : > { %1249 = vsyncadd (%p1417_p7), %s257_s11, 4294966784  ;;  %s1496_s6 = sand.u32 1, %s1264_s19   ;;  %s868_s16 = sshll.u32 %s1284_s24, 4 }
  0x51   : > { %s866_s14 = sshll.u32 %s1496_s6, 5  ;;  %s867_s10 = sshll.u32 %s1496_s6, 3 }
  0x52   : > { %p304_p12 = scmp.lt.s32.totalorder %s868_s16, 47  ;;  %s870_s13 = sshll.u32 %s1288_s25, 3 }
  0x53   : > { %p310_p2 = scmp.lt.s32.totalorder %s870_s13, 39  ;;  %s1512_s27 = scalar_lea.vmem [#allocation6], %s866_s14 }
  0x54   : > { %s1688_s16 = smov (!%p304_p12, %s868_s16), 47  ;;  %s1514_s26 = scalar_lea.vmem [#allocation7], %s867_s10 }
  0x55   : > { %s1690_s13 = smov (!%p310_p2, %s870_s13), 39  ;;  %s869_s9 = sshll.u32 %s1688_s16, 2 }
  0x56   : > { %s1505_s12 = scalar_lea.vmem %s1644_s1, %s869_s9  ;;  %s871_s30 = sshll.u32 %s1690_s13, 3 }
  0x57   : > { %s1510_s0 = scalar_lea.vmem %s1645_s2, %s871_s30  ;;  %p872_p7 = scmp.ne.s32.totalorder %s1284_s24, 0 }
  0x58   : > { %v1306_v0 = vmov (!%p872_p7), 0.0  }
  0x59   : > { %320 = sbr.rel (%p872_p7) target bundleno = 96 (0x60), region = 44  ;;  %321 = vst [vmem:[#allocation2] sm:$0xff] (!%p872_p7), %v1306_v0  ;;  %322 = vst [vmem:[#allocation2 + $0x8] sm:$0xff] (!%p872_p7), %v1306_v0 }
  0x5a   : > { %323 = vst [vmem:[#allocation2 + $0x10] sm:$0xff] (!%p872_p7), %v1306_v0  ;;  %324 = vst [vmem:[#allocation2 + $0x18] sm:$0xff] (!%p872_p7), %v1306_v0 }
  0x5b   : > { %325 = vst [vmem:[#allocation2 + $0x20] sm:$0xff] (!%p872_p7), %v1306_v0  ;;  %326 = vst [vmem:[#allocation2 + $0x28] sm:$0xff] (!%p872_p7), %v1306_v0 }
  0x5c   : > { %327 = vst [vmem:[#allocation2 + $0x30] sm:$0xff] (!%p872_p7), %v1306_v0  ;;  %328 = vst [vmem:[#allocation2 + $0x38] sm:$0xff] (!%p872_p7), %v1306_v0 }
  0x60 PF: > { %v1102_v1 = vld [vmem:[%s1505_s12] sm:$0xff]   ;;  %v1103_v2 = vld [vmem:[%s1505_s12 + $0x8] sm:$0xff]   ;;  %v1104_v3 = vld [vmem:[%s1505_s12 + $0x10] sm:$0xff]   ;;  %p885_p4 = scmp.ne.s32.totalorder %s1284_s24, 2 }
  0x61   : > { %946 = vmatprep.subr.bf16.mxu0 %v1102_v1  ;;  %970 = vmatprep.subr.bf16.mxu1 %v1102_v1  ;;  %v1105_v4 = vld [vmem:[%s1505_s12 + $0x18] sm:$0xff]   ;;  %v1110_v5 = vld [vmem:[%s1489_s7] sm:$0xff]   ;;  %v1111_v6 = vld [vmem:[%s1489_s7 + $0x10] sm:$0xff]   ;;  %v1307_v39 = vmov (!%p885_p4), 0   ;;  %v1308_v46 = vmov (!%p885_p4), 0.0  }
  0x62   : > { %947 = vmatpush3.bf16.msra.mxu0 %v1102_v1  ;;  %978 = vmatpush3.bf16.msra.mxu1 %v1102_v1  ;;  %v1106_v7 = vld [vmem:[%s1505_s12 + $0x20] sm:$0xff]   ;;  %v1107_v8 = vld [vmem:[%s1505_s12 + $0x28] sm:$0xff]   ;;  %v1108_v9 = vld [vmem:[%s1505_s12 + $0x30] sm:$0xff]   ;;  %645 = vst [vmem:[%s1514_s26] sm:$0xff] (!%p885_p4), %v1308_v46 }
  0x63   : > { %948 = vmatprep.subr.bf16.mxu0 %v1103_v2  ;;  %971 = vmatprep.subr.bf16.mxu1 %v1103_v2  ;;  %v1109_v10 = vld [vmem:[%s1505_s12 + $0x38] sm:$0xff]   ;;  %v1112_v11 = vld [vmem:[%s1489_s7 + $0x8] sm:$0xff]   ;;  %v331_v13 = vld [vmem:[#allocation2 + $0x10] sm:$0xff] }
  0x64   : > { %962 = vmatprep.mubr.bf16.mxu0 %v1110_v5  ;;  %966 = vmatprep.mubr.bf16.mxu1 %v1111_v6  ;;  %v1113_v12 = vld [vmem:[%s1489_s7 + $0x18] sm:$0xff]   ;;  %v335_v14 = vld [vmem:[#allocation2 + $0x30] sm:$0xff]  ;;  %v329_v15 = vld [vmem:[#allocation2] sm:$0xff] }
  0x65   : > { %v333_v16 = vld [vmem:[#allocation2 + $0x20] sm:$0xff]  ;;  %v332_v19 = vld [vmem:[#allocation2 + $0x18] sm:$0xff]  ;;  %v330_v25 = vld [vmem:[#allocation2 + $0x8] sm:$0xff]  ;;  %1115 = vset.pattern.permute.xlu1 (!%p885_p4), %v1307_v39  ;;  %1114 = vset.pattern.permute.xlu0 (!%p885_p4), %v1307_v39 }
  0x66   : > { %949 = vmatpush3.bf16.msra.mxu0 %v1103_v2  ;;  %979 = vmatpush3.bf16.msra.mxu1 %v1103_v2  ;;  %v336_v20 = vld [vmem:[#allocation2 + $0x38] sm:$0xff]  ;;  %v334_v26 = vld [vmem:[#allocation2 + $0x28] sm:$0xff]  ;;  %v528_v37 = vld [vmem:[%s1510_s0 + $0x10] sm:$0xff] (!%p885_p4) }
  0x67   : > { %950 = vmatprep.subr.bf16.mxu0 %v1104_v3  ;;  %972 = vmatprep.subr.bf16.mxu1 %v1104_v3  ;;  %v526_v38 = vld [vmem:[%s1510_s0] sm:$0xff] (!%p885_p4)  ;;  %v529_v40 = vld [vmem:[%s1510_s0 + $0x18] sm:$0xff] (!%p885_p4)  ;;  %v527_v41 = vld [vmem:[%s1510_s0 + $0x8] sm:$0xff] (!%p885_p4) }
  0x68   : > { %546 = vperm.xlu1 (!%p885_p4), %1115, %v528_v37   ;;  %536 = vperm.xlu0 (!%p885_p4), %1114, %v526_v38   ;;  %v531_v42 = vld [vmem:[%s1510_s0 + $0x28] sm:$0xff] (!%p885_p4)  ;;  %v530_v43 = vld [vmem:[%s1510_s0 + $0x20] sm:$0xff] (!%p885_p4)  ;;  %v533_v44 = vld [vmem:[%s1510_s0 + $0x38] sm:$0xff] (!%p885_p4) }
  0x69   : > { %v532_v45 = vld [vmem:[%s1510_s0 + $0x30] sm:$0xff] (!%p885_p4)  ;;  %v886_v51 = vld [vmem:[%s1646_s3] ss:$0 sm:$0xff] (!%p885_p4) }
  0x6a   : > { %951 = vmatpush3.bf16.msra.mxu0 %v1104_v3  ;;  %980 = vmatpush3.bf16.msra.mxu1 %v1104_v3 }
  0x6b   : > { %952 = vmatprep.subr.bf16.mxu0 %v1105_v4  ;;  %973 = vmatprep.subr.bf16.mxu1 %v1105_v4 }
  0x6c   : > { %551 = vperm.xlu1 (!%p885_p4), %1115, %v529_v40   ;;  %541 = vperm.xlu0 (!%p885_p4), %1114, %v527_v41  }
  0x6e   : > { %953 = vmatpush3.bf16.msra.mxu0 %v1105_v4  ;;  %981 = vmatpush3.bf16.msra.mxu1 %v1105_v4 }
  0x6f   : > { %954 = vmatprep.subr.bf16.mxu0 %v1106_v7  ;;  %974 = vmatprep.subr.bf16.mxu1 %v1106_v7 }
  0x70   : > { %561 = vperm.xlu1 (!%p885_p4), %1115, %v531_v42   ;;  %556 = vperm.xlu0 (!%p885_p4), %1114, %v530_v43  }
  0x72   : > { %955 = vmatpush3.bf16.msra.mxu0 %v1106_v7  ;;  %982 = vmatpush3.bf16.msra.mxu1 %v1106_v7 }
  0x73   : > { %956 = vmatprep.subr.bf16.mxu0 %v1107_v8  ;;  %975 = vmatprep.subr.bf16.mxu1 %v1107_v8 }
  0x74   : > { %571 = vperm.xlu1 (!%p885_p4), %1115, %v533_v44   ;;  %566 = vperm.xlu0 (!%p885_p4), %1114, %v532_v45  }
  0x76   : > { %957 = vmatpush3.bf16.msra.mxu0 %v1107_v8  ;;  %983 = vmatpush3.bf16.msra.mxu1 %v1107_v8 }
  0x77   : > { %958 = vmatprep.subr.bf16.mxu0 %v1108_v9  ;;  %976 = vmatprep.subr.bf16.mxu1 %v1108_v9 }
  0x7a   : > { %959 = vmatpush3.bf16.msra.mxu0 %v1108_v9  ;;  %984 = vmatpush3.bf16.msra.mxu1 %v1108_v9 }
  0x7b   : > { %960 = vmatprep.subr.bf16.mxu0 %v1109_v10  ;;  %977 = vmatprep.subr.bf16.mxu1 %v1109_v10 }
  0x7e   : > { %961 = vmatpush3.bf16.msra.mxu0 %v1109_v10  ;;  %985 = vmatpush3.bf16.msra.mxu1 %v1109_v10 }
  0x81   : > { %963 = vmatmul.mubr.bf16.vlgmr.msra.gmra.mrb[0].mxu0 %v1112_v11  ;;  %967 = vmatmul.mubr.bf16.vlgmr.msra.gmra.mrb[0].mxu1 %v1113_v12 }
  0xe7   : > { %v547_v49 = vpop.permute.xlu1 (!%p885_p4), %546  ;;  %v537_v50 = vpop.permute.xlu0 (!%p885_p4), %536 }
  0xeb   : > { %v552_v58 = vpop.permute.xlu1 (!%p885_p4), %551  ;;  %v542_v59 = vpop.permute.xlu0 (!%p885_p4), %541 }
  0xef   : > { %v562_v4 = vpop.permute.xlu1 (!%p885_p4), %561  ;;  %v557_v5 = vpop.permute.xlu0 (!%p885_p4), %556 }
 0x154   : > { %v964_v17 = vpop.f32.mrb[0].mxu0  ;;  %v968_v18 = vpop.f32.mrb[0].mxu1  ;;  %517 = sbr.rel (%p885_p4) target bundleno = 389 (0x185), region = 48 }
 0x155   : > { %v500_v21 = vadd.f32 %v964_v17, %v331_v13  ;;  %v504_v22 = vadd.f32 %v968_v18, %v335_v14  ;;  %v467_v23 = vpop.f32.mrb[1].mxu0  ;;  %v483_v24 = vpop.f32.mrb[1].mxu1 }
 0x156   : > { %v498_v27 = vadd.f32 %v467_v23, %v329_v15  ;;  %v502_v28 = vadd.f32 %v483_v24, %v333_v16  ;;  %v965_v29 = vpop.f32.mrb[2].mxu0  ;;  %v969_v30 = vpop.f32.mrb[2].mxu1 }
 0x157   : > { %508 = vst [vmem:[#allocation2 + $0x10] sm:$0xff] %v500_v21  ;;  %512 = vst [vmem:[#allocation2 + $0x30] sm:$0xff] %v504_v22  ;;  %v501_v31 = vadd.f32 %v965_v29, %v332_v19  ;;  %v505_v32 = vadd.f32 %v969_v30, %v336_v20  ;;  %v470_v33 = vpop.f32.mrb[3].mxu0  ;;  %v486_v34 = vpop.f32.mrb[3].mxu1 }
 0x158   : > { %506 = vst [vmem:[#allocation2] sm:$0xff] %v498_v27  ;;  %510 = vst [vmem:[#allocation2 + $0x20] sm:$0xff] %v502_v28  ;;  %v499_v35 = vadd.f32 %v470_v33, %v330_v25  ;;  %v503_v36 = vadd.f32 %v486_v34, %v334_v26  ;;  %v572_v19 = vpop.permute.xlu1 (!%p885_p4), %571  ;;  %v567_v20 = vpop.permute.xlu0 (!%p885_p4), %566 }
 0x159   : > { %509 = vst [vmem:[#allocation2 + $0x18] sm:$0xff] %v501_v31  ;;  %513 = vst [vmem:[#allocation2 + $0x38] sm:$0xff] %v505_v32 }
 0x15a   : > { %507 = vst [vmem:[#allocation2 + $0x8] sm:$0xff] %v499_v35  ;;  %511 = vst [vmem:[#allocation2 + $0x28] sm:$0xff] %v503_v36 }
 0x15e   : > { %v520_v47 = vld [vmem:[#allocation2 + $0x10] sm:$0xff] }
 0x15f   : > { %v518_v48 = vld [vmem:[#allocation2] sm:$0xff]  ;;  %v576_v52 = vmul.f32 %v547_v49, %v520_v47  ;;  %v524_v11 = vld [vmem:[#allocation2 + $0x30] sm:$0xff] }
 0x160   : > { %v574_v53 = vmul.f32 %v537_v50, %v518_v48  ;;  %v521_v54 = vld [vmem:[#allocation2 + $0x18] sm:$0xff]  ;;  %v522_v63 = vld [vmem:[#allocation2 + $0x20] sm:$0xff]  ;;  %v580_v23 = vmul.f32 %v567_v20, %v524_v11 }
 0x161   : > { %v519_v55 = vld [vmem:[#allocation2 + $0x8] sm:$0xff]  ;;  %v591_v56 = vadd.f32 %v886_v51, %v576_v52  ;;  %v577_v60 = vmul.f32 %v552_v58, %v521_v54  ;;  %v578_v9 = vmul.f32 %v557_v5, %v522_v63  ;;  %v525_v10 = vld [vmem:[#allocation2 + $0x38] sm:$0xff] }
 0x162   : > { %v589_v57 = vadd.f32 %v886_v51, %v574_v53  ;;  %v575_v61 = vmul.f32 %v542_v59, %v519_v55  ;;  %v523_v62 = vld [vmem:[#allocation2 + $0x28] sm:$0xff]  ;;  %v581_v22 = vmul.f32 %v572_v19, %v525_v10  ;;  %v595_v30 = vadd.f32 %v886_v51, %v580_v23 }
 0x163   : > { %v599_v0 = vmax.f32 %v591_v56, 0.0  ;;  %v592_v1 = vadd.f32 %v886_v51, %v577_v60  ;;  %v579_v8 = vmul.f32 %v562_v4, %v523_v62  ;;  %v593_v18 = vadd.f32 %v886_v51, %v578_v9 }
 0x164   : > { %v590_v2 = vadd.f32 %v886_v51, %v575_v61  ;;  %v597_v3 = vmax.f32 %v589_v57, 0.0  ;;  %v596_v29 = vadd.f32 %v886_v51, %v581_v22  ;;  %v603_v36 = vmax.f32 %v595_v30, 0.0 }
 0x165   : > { %v600_v6 = vmax.f32 %v592_v1, 0.0  ;;  %v594_v17 = vadd.f32 %v886_v51, %v579_v8  ;;  %v662_v24 = vmul.f32 %v599_v0, %v599_v0  ;;  %v601_v27 = vmax.f32 %v593_v18, 0.0 }
 0x166   : > { %v598_v7 = vmax.f32 %v590_v2, 0.0  ;;  %v660_v15 = vmul.f32 %v597_v3, %v597_v3  ;;  %v604_v35 = vmax.f32 %v596_v29, 0.0  ;;  %v666_v44 = vmul.f32 %v603_v36, %v603_v36 }
 0x167   : > { %v919_v12 = vpack.c.bf16 %v600_v6, %v599_v0  ;;  %v602_v26 = vmax.f32 %v594_v17, 0.0  ;;  %v663_v31 = vmul.f32 %v600_v6, %v600_v6  ;;  %v664_v37 = vmul.f32 %v601_v27, %v601_v27 }
 0x168   : > { %v914_v13 = vpack.c.bf16 %v598_v7, %v597_v3  ;;  %v646_v14 = vadd.f32 %v598_v7, %v597_v3  ;;  %v661_v16 = vmul.f32 %v598_v7, %v598_v7  ;;  %v929_v39 = vpack.c.bf16 %v604_v35, %v603_v36 }
 0x169   : > { %931 = vst [vmem:[%s1512_s27 + $0x8] sm:$0xff] %v919_v12   ;;  %v924_v33 = vpack.c.bf16 %v602_v26, %v601_v27  ;;  %v665_v41 = vmul.f32 %v602_v26, %v602_v26  ;;  %v667_v47 = vmul.f32 %v604_v35, %v604_v35 }
 0x16a   : > { %915 = vst [vmem:[%s1512_s27] sm:$0xff] %v914_v13   ;;  %v647_v21 = vadd.f32 %v646_v14, %v599_v0  ;;  %v668_v25 = vadd.f32 %v661_v16, %v660_v15  ;;  %933 = vst [vmem:[%s1512_s27 + $0x18] sm:$0xff] %v929_v39  }
 0x16b   : > { %932 = vst [vmem:[%s1512_s27 + $0x10] sm:$0xff] %v924_v33  }
 0x16c   : > { %v648_v28 = vadd.f32 %v647_v21, %v600_v6  ;;  %v669_v32 = vadd.f32 %v668_v25, %v662_v24 }
 0x16e   : > { %v649_v34 = vadd.f32 %v648_v28, %v601_v27  ;;  %v670_v38 = vadd.f32 %v669_v32, %v663_v31 }
 0x170   : > { %v650_v40 = vadd.f32 %v649_v34, %v602_v26  ;;  %v671_v42 = vadd.f32 %v670_v38, %v664_v37 }
 0x172   : > { %v651_v43 = vadd.f32 %v650_v40, %v603_v36  ;;  %v672_v45 = vadd.f32 %v671_v42, %v665_v41 }
 0x174   : > { %v652_v46 = vadd.f32 %v651_v43, %v604_v35  ;;  %v673_v48 = vadd.f32 %v672_v45, %v666_v44 }
 0x176   : > { %v653_v49 = vrot.slane %v652_v46, 4  ;;  %v674_v50 = vadd.f32 %v673_v48, %v667_v47 }
 0x178   : > { %v654_v51 = vadd.f32 %v653_v49, %v652_v46  ;;  %v675_v52 = vrot.slane %v674_v50, 4 }
 0x17a   : > { %v655_v53 = vrot.slane %v654_v51, 2  ;;  %v676_v54 = vadd.f32 %v675_v52, %v674_v50 }
 0x17c   : > { %v656_v55 = vadd.f32 %v655_v53, %v654_v51  ;;  %v677_v56 = vrot.slane %v676_v54, 2 }
 0x17e   : > { %v657_v57 = vrot.slane %v656_v55, 1  ;;  %v678_v58 = vadd.f32 %v677_v56, %v676_v54 }
 0x180   : > { %v658_v59 = vadd.f32 %v657_v57, %v656_v55  ;;  %v679_v60 = vrot.slane %v678_v58, 1 }
 0x182   : > { %659 = vst [vmem:[%s1514_s26] sm:$0x1] %v658_v59  ;;  %v680_v61 = vadd.f32 %v679_v60, %v678_v58 }
 0x184   : > { %681 = vst [vmem:[%s1514_s26 + $0x1] sm:$0x1] %v680_v61 }
 0x185 PF: > { %s910_s0 = sshll.u32 %s1288_s25, 9  ;;  %s701_s13 = sshll.u32 %s1512_s27, 4  ;;  %s1555_s13 = int_to_ptr.vmem [resolvable:$true] %s701_s13 }
 0x186   : > { %s1552_s10 = scalar_lea.hbm %s1647_s4, %s910_s0  ;;  %s683_s9 = scalar_lea.sflag [#allocation5], %s1496_s6 }
 0x187   : > { %s1146_s17 = scalar_lea.vmem %s1555_s13, 512  ;;  %p1667_p1 = scmp.ne.s32.totalorder %s1661_s15, 0 }
 0x188   : > { %p1147_p0 = scmp.ne.s32.totalorder %s1555_s13, %s1146_s17  ;;  %s1309_s8 = smov [#allocation6]  }
 0x189   : > { %s1150_s12 = sshll.u32 %s1309_s8, 4  ;;  %s1151_s12 = int_to_ptr.vmem [resolvable:$false] %s1150_s12 }
 0x18a   : > { %p1148_p3 = pnand %p1147_p0, %p1667_p1  ;;  %s1152_s30 = scalar_lea.vmem %s1151_s12, 1024 }
 0x18b   : > { %p1153_p9 = scmp.lt.s32.totalorder %s1555_s13, %s1151_s12  ;;  %p1154_p10 = scmp.lt.s32.totalorder %s1152_s30, %s1146_s17 }
 0x18c   : > { %p1149_p6 = pneg %p1148_p3 }
 0x18d   : > { %p1155_p11 = por %p1154_p10, %p1153_p9 }
 0x18f   : > { %p1156_p5 = pnand %p1155_p11, %p1149_p6 }
 0x191   : > { %1159 = shalt.err (!%p1156_p5)
}
 0x192   : > { %s1160_s27 = scalar_lea.hbm %s1552_s10, 512  ;;  %s1164_s24 = scalar_lea.hbm %s1647_s4, 2560 }
 0x193   : > { %p1161_p8 = scmp.ne.s32.totalorder %s1552_s10, %s1160_s27  ;;  %p1165_p2 = scmp.lt.u32.totalorder %s1552_s10, %s1647_s4 }
 0x194   : > { %p1166_p7 = scmp.lt.u32.totalorder %s1164_s24, %s1160_s27  ;;  %p1168_p0 = scmp.lt.u32.totalorder %s1160_s27, %s1552_s10 }
 0x195   : > { %p1162_p13 = pnand %p1161_p8, %p1667_p1 }
 0x196   : > { %p1167_p4 = por %p1166_p7, %p1165_p2 }
 0x197   : > { %p1163_p12 = pneg %p1162_p13 }
 0x198   : > { %p1169_p3 = por %p1168_p0, %p1167_p4 }
 0x19a   : > { %p1170_p6 = pnand %p1169_p3, %p1163_p12 }
 0x19c   : > { %1173 = shalt.err (!%p1170_p6)
}
 0x19d   : > { %s1310_s16 = smov 64   ;;  %s1311_s14 = smov 4  }
 0x19e   : > { %989 = dma.vmem_to_hbm [thread:$0]  (%p1667_p1), %s1555_s13, 512, %s1552_s10, %s683_s9, %s1310_s16, %s1310_s16, %s1311_s14  }
 0x19f   : > { %s899_s17 = sshll.u32 %s1288_s25, 7  ;;  %s717_s8 = sshll.u32 %s1514_s26, 4  ;;  %s718_s8 = int_to_ptr.vmem [resolvable:$true] %s717_s8 }
 0x1a0   : > { %s1586_s27 = scalar_lea.hbm %s1648_s5, %s899_s17  ;;  %s688_s29 = scalar_lea.sflag [#allocation8], %s1496_s6 }
 0x1a1   : > { %s1174_s11 = scalar_lea.vmem %s718_s8, 128  ;;  %s1312_s24 = smov [#allocation7]  }
 0x1a2   : > { %p1175_p9 = scmp.ne.s32.totalorder %s718_s8, %s1174_s11  ;;  %s1178_s7 = sshll.u32 %s1312_s24, 4  ;;  %s1179_s7 = int_to_ptr.vmem [resolvable:$false] %s1178_s7 }
 0x1a3   : > { %s1180_s0 = scalar_lea.vmem %s1179_s7, 256  ;;  %p1181_p5 = scmp.lt.s32.totalorder %s718_s8, %s1179_s7 }
 0x1a4   : > { %p1176_p10 = pnand %p1175_p9, %p1667_p1  ;;  %p1182_p8 = scmp.lt.s32.totalorder %s1180_s0, %s1174_s11 }
 0x1a6   : > { %p1177_p11 = pneg %p1176_p10  ;;  %p1183_p13 = por %p1182_p8, %p1181_p5 }
 0x1a8   : > { %p1184_p12 = pnand %p1183_p13, %p1177_p11 }
 0x1aa   : > { %1187 = shalt.err (!%p1184_p12)
}
 0x1ab   : > { %s1188_s25 = scalar_lea.hbm %s1586_s27, 128  ;;  %s1192_s10 = scalar_lea.hbm %s1648_s5, 640 }
 0x1ac   : > { %p1189_p2 = scmp.ne.s32.totalorder %s1586_s27, %s1188_s25  ;;  %p1193_p0 = scmp.lt.u32.totalorder %s1586_s27, %s1648_s5 }
 0x1ad   : > { %p1194_p3 = scmp.lt.u32.totalorder %s1192_s10, %s1188_s25  ;;  %p1196_p9 = scmp.lt.u32.totalorder %s1188_s25, %s1586_s27 }
 0x1ae   : > { %p1190_p7 = pnand %p1189_p2, %p1667_p1 }
 0x1af   : > { %p1195_p6 = por %p1194_p3, %p1193_p0 }
 0x1b0   : > { %p1191_p4 = pneg %p1190_p7 }
 0x1b1   : > { %p1197_p10 = por %p1196_p9, %p1195_p6 }
 0x1b3   : > { %p1198_p11 = pnand %p1197_p10, %p1191_p4 }
 0x1b5   : > { %1201 = shalt.err (!%p1198_p11)
}
 0x1b6   : > { %990 = dma.vmem_to_hbm [thread:$0]  (%p1667_p1), %s718_s8, 128, %s1586_s27, %s688_s29  }
 0x1b7 PF: > { %p1005_p5 = scmp.ge.s32.totalorder %s1300_s28, 2  ;;  %s729_s16 = sand.u32 1, %s1260_s18  }
 0x1b8   : > { %p1668_p8 = scmp.ne.s32.totalorder %s1664_s21, 0  ;;  %s730_s14 = scalar_lea.sflag [#allocation5], %s729_s16 }
 0x1ba   : > { %p998_p13 = pnand %p1005_p5, %p1668_p8 }
 0x1bc   : > { %1251 = dma.done.wait (!%p998_p13), %s730_s14, 512  }
 0x1bd   : > { %1253 = vsyncadd (!%p998_p13), %s730_s14, 4294966784  ;;  %s739_s17 = scalar_lea.sflag [#allocation8], %s729_s16 }
 0x1be   : > { %1255 = dma.done.wait (!%p998_p13), %s739_s17, 128  }
 0x1bf   : > { %1257 = vsyncadd (!%p998_p13), %s739_s17, 4294967168  ;;  %s25_s28 = sadd.s32 1, %s1300_s28   ;;  %s1669_s15 = sld [smem:[#allocation16_spill]] }
 0x1c0   : > { %p22_p12 = scmp.ge.s32.totalorder %s25_s28, 17   ;;  %s1670_s8 = sld [smem:[#allocation17_spill]] }
 0x1c1   : > { %s1671_s24 = sld [smem:[#allocation12_spill]]  ;;  %s1672_s25 = sld [smem:[#allocation13_spill]] }
 0x1c2   : > { %s1673_s26 = sld [smem:[#allocation14_spill]]  ;;  %s1674_s27 = sld [smem:[#allocation15_spill]] }
 0x1c3   : > { %s1675_s18 = smov %s1264_s19  ;;  %s1676_s19 = smov %s1268_s20 }
 0x1c4   : > { %s1678_s21 = smov %s1276_s22  ;;  %s1679_s22 = smov %s1280_s23 }
 0x1c5   : > { %s1677_s20 = smov %s1669_s15  ;;  %24 = sbr.rel (!%p22_p12) target bundleno = 13 (0xd), region = 112 }
 0x1c6   : > { %s1680_s23 = smov %s1670_s8 }
 0x1cc   :  { %744 = vsyncpa [#allocation4], 1 }
 0x1cd   :  { %746 = vsyncpa [#allocation4 + $0x1], 1 }
 0x1ce   :  { %747 = vsyncpa [#allocation5], 1 }
 0x1cf   :  { %749 = vsyncpa [#allocation5 + $0x1], 1 }
 0x1d0   :  { %750 = vsyncpa [#allocation8], 1 }
 0x1d1   :  { %752 = vsyncpa [#allocation8 + $0x1], 1 }

</bundles_post_ra>
